<compile_context>
chip_gen: v6e
topology: v6e:2x2x1
jax: 0.10.0
libtpu: 0.0.40
codegen_flags: <defaults>
</compile_context>

<pallas_src>
import functools

import numpy as np
import jax
import jax.numpy as jnp
from jax.experimental import pallas as pl
from jax.experimental.pallas import tpu as pltpu


def _round_up(x, m):
    return (x + m - 1) // m * m


def _log_spectrum_kernel(x_ref, basis_ref, out_ref, *, k_pad):
    # x_ref: (TM, N) f32; basis_ref: (N, 2*k_pad) f32 = [cos | -sin] (ortho-scaled)
    # out_ref: (TM, 2*k_pad) f32 packed as [Re(X*X)+eps | Im(X*X)]
    y = jnp.dot(x_ref[...], basis_ref[...], preferred_element_type=jnp.float32)
    re = y[:, :k_pad]
    im = y[:, k_pad:]
    # (re + i*im)^2 + eps  in real arithmetic (eps added to real part only, matching
    # PyTorch's complex + real-scalar semantics).
    out_ref[:, :k_pad] = re * re - im * im + 1e-7
    out_ref[:, k_pad:] = 2.0 * re * im


@functools.lru_cache(maxsize=None)
def _dft_basis(fft_size):
    """Single packed (N, 2*K_pad) ortho real-DFT basis: [cos | -sin], zero-padded lanes."""
    K = fft_size // 2 + 1
    k_pad = _round_up(K, 128)
    n = np.arange(fft_size, dtype=np.float64)[:, None]
    k = np.arange(K, dtype=np.float64)[None, :]
    ang = 2.0 * np.pi * n * k / fft_size
    scale = 1.0 / np.sqrt(fft_size)                      # norm='ortho'
    basis = np.zeros((fft_size, 2 * k_pad), dtype=np.float32)
    basis[:, :K] = (np.cos(ang) * scale).astype(np.float32)
    basis[:, k_pad:k_pad + K] = (-np.sin(ang) * scale).astype(np.float32)
    return jnp.asarray(basis), k_pad


@functools.partial(jax.jit, static_argnames=("fft_size", "k_pad"))
def _log_spectrum_jit(x, basis, *, fft_size, k_pad):
    B, N = x.shape
    K = fft_size // 2 + 1

    # Batch tile: multiple of 8 sublanes, capped at 256 (MXU-friendly on v6e/v7x).
    tm = min(256, _round_up(B, 8))
    b_pad = _round_up(B, tm)
    x_p = x if b_pad == B else jnp.pad(x, ((0, b_pad - B), (0, 0)))
    grid = (b_pad // tm,)

    # VMEM budget: resident basis + double-buffered x / packed-output tiles.
    basis_bytes = N * 2 * k_pad * 4
    tile_bytes = 2 * (tm * N * 4) + 2 * (tm * 2 * k_pad * 4)
    vmem_limit = int(min(max(basis_bytes + tile_bytes + (2 << 20), 32 << 20), 64 << 20))

    kernel = functools.partial(_log_spectrum_kernel, k_pad=k_pad)
    packed = pl.pallas_call(
        kernel,
        out_shape=jax.ShapeDtypeStruct((b_pad, 2 * k_pad), jnp.float32),
        grid_spec=pltpu.PrefetchScalarGridSpec(
            num_scalar_prefetch=0,
            grid=grid,
            in_specs=[
                pl.BlockSpec((tm, N), lambda i: (i, 0)),          # x tile (pipelined)
                pl.BlockSpec((N, 2 * k_pad), lambda i: (0, 0)),   # basis (VMEM-resident)
            ],
            out_specs=pl.BlockSpec((tm, 2 * k_pad), lambda i: (i, 0)),
        ),
        compiler_params=pltpu.CompilerParams(
            dimension_semantics=("parallel",),
            vmem_limit_bytes=vmem_limit,
        ),
    )(x_p, basis)

    re2 = packed[:B, :K]
    im2 = packed[:B, k_pad:k_pad + K]
    # Complex log epilogue (plain JAX, fused into the same jit program).
    return jnp.log(jax.lax.complex(re2, im2))            # complex64, (B, K)


def log_spectrum_forward(x, fft_size):
    B, N = x.shape
    assert N == fft_size, "forward assumes last dim == fft_size (as in the module)"
    basis, k_pad = _dft_basis(fft_size)
    return _log_spectrum_jit(x, basis, fft_size=fft_size, k_pad=k_pad)


if __name__ == "__main__":
    input_size = 256                      # small, consistent with the module (power of 2)
    batch = 2
    key = jax.random.PRNGKey(0)
    x = jax.random.normal(key, (batch, input_size), dtype=jnp.float32)

    out = log_spectrum_forward(x, input_size)
    jax.block_until_ready(out)

    assert out.shape == (batch, input_size // 2 + 1)
    assert out.dtype == jnp.complex64

    # Branch-cut-safe sanity check: exp(log(X*X+eps)) should match X*X+eps from the
    # built-in rfft reference.
    X = jnp.fft.rfft(x, n=input_size, axis=-1, norm="ortho")
    ref_sq = X * X + 1e-7
    got_sq = jnp.exp(out)
    assert np.allclose(np.asarray(got_sq), np.asarray(ref_sq), rtol=1e-3, atol=1e-3)

    print("KERNEL_OK")
</pallas_src>

<mosaic_0001>
module attributes {stable_mosaic.version = 11 : i64} {
  func.func @_log_spectrum_kernel(%arg0: i32, %arg1: memref<8x256xf32, #tpu.memory_space<vmem>>, %arg2: memref<256x512xf32, #tpu.memory_space<vmem>>, %arg3: memref<8x512xf32, #tpu.memory_space<vmem>>) attributes {dimension_semantics = [#tpu.dimension_semantics<parallel>], iteration_bounds = array<i64: 1>, scalar_prefetch = 0 : i64, scratch_operands = 0 : i64, tpu.core_type = #tpu.core_type<tc>, window_params = [{transform_indices = @transform_0, window_bounds = array<i64: 8, 256>}, {pipeline_mode = #tpu.pipeline_mode<synchronous>, transform_indices = @transform_1, window_bounds = array<i64: 256, 512>}, {transform_indices = @transform_2, window_bounds = array<i64: 8, 512>}]} {
    %c0 = arith.constant 0 : index
    %c0_0 = arith.constant 0 : index
    %0 = vector.load %arg1[%c0, %c0_0] : memref<8x256xf32, #tpu.memory_space<vmem>>, vector<8x256xf32>
    %c0_1 = arith.constant 0 : index
    %c0_2 = arith.constant 0 : index
    %1 = vector.load %arg2[%c0_1, %c0_2] : memref<256x512xf32, #tpu.memory_space<vmem>>, vector<256x512xf32>
    %cst = arith.constant dense<0.000000e+00> : vector<8x512xf32>
    %2 = tpu.matmul %0, %1, %cst {dimension_numbers = #tpu.dot_dimension_numbers<[1], [0], [0], [1], [0, 0, 1, 1], [], []>} : vector<8x256xf32>, vector<256x512xf32>, vector<8x512xf32> -> vector<8x512xf32>
    %3 = vector.extract_strided_slice %2 {offsets = [0, 0], sizes = [8, 256], strides = [1, 1]} : vector<8x512xf32> to vector<8x256xf32>
    %4 = vector.extract_strided_slice %2 {offsets = [0, 256], sizes = [8, 256], strides = [1, 1]} : vector<8x512xf32> to vector<8x256xf32>
    %5 = arith.mulf %3, %3 : vector<8x256xf32>
    %6 = arith.mulf %4, %4 : vector<8x256xf32>
    %7 = arith.subf %5, %6 : vector<8x256xf32>
    %cst_3 = arith.constant 1.000000e-07 : f32
    %8 = vector.broadcast %cst_3 : f32 to vector<8x256xf32>
    %9 = arith.addf %7, %8 : vector<8x256xf32>
    %c0_4 = arith.constant 0 : index
    %c0_5 = arith.constant 0 : index
    %10 = vector.load %arg3[%c0_4, %c0_5] : memref<8x512xf32, #tpu.memory_space<vmem>>, vector<8x256xf32>
    tpu.vector_store %arg3[%c0_4, %c0_5], %9 {strides = array<i32>} : memref<8x512xf32, #tpu.memory_space<vmem>>, vector<8x256xf32>,
    %cst_6 = arith.constant 2.000000e+00 : f32
    %11 = vector.broadcast %cst_6 : f32 to vector<8x256xf32>
    %12 = arith.mulf %11, %3 : vector<8x256xf32>
    %13 = arith.mulf %12, %4 : vector<8x256xf32>
    %c0_7 = arith.constant 0 : index
    %c256 = arith.constant 256 : index
    %14 = vector.load %arg3[%c0_7, %c256] : memref<8x512xf32, #tpu.memory_space<vmem>>, vector<8x256xf32>
    tpu.vector_store %arg3[%c0_7, %c256], %13 {strides = array<i32>} : memref<8x512xf32, #tpu.memory_space<vmem>>, vector<8x256xf32>,
    return
  }
  func.func @transform_0(%arg0: i32) -> (i32, i32) {
    %c0_i32 = arith.constant 0 : i32
    %c0_i32_0 = arith.constant 0 : i32
    return %arg0, %c0_i32 : i32, i32
  }
  func.func @transform_1(%arg0: i32) -> (i32, i32) {
    %c0_i32 = arith.constant 0 : i32
    %c0_i32_0 = arith.constant 0 : i32
    %c0_i32_1 = arith.constant 0 : i32
    return %c0_i32, %c0_i32_0 : i32, i32
  }
  func.func @transform_2(%arg0: i32) -> (i32, i32) {
    %c0_i32 = arith.constant 0 : i32
    %c0_i32_0 = arith.constant 0 : i32
    return %arg0, %c0_i32 : i32, i32
  }
}

</mosaic_0001>

<bundles_post_ra>
// kernel: custom-call
= control target key start
LH: loop header
LB: loop body
LE: loop exit
PB: predicated region body
PF: predicated region fallthrough
CT: control target
= control target key end

     0   :  { %s92_s0 = inlined_call_operand.vmem [shape: f32[2,129], index: 0, kind: input, shape index: {}]   ;;  %s93_s1 = inlined_call_operand.vmem [shape: f32[2,129], index: 1, kind: input, shape index: {}]   ;;  %s94_s2 = inlined_call_operand.hbm [shape: c64[2,129], index: 2, kind: output, shape index: {}]  }
   0x1   :  { %s3_s11 = scalar_lea.hbm %s94_s2, 64 }
   0x2   :  { %4 = vsyncpa [#allocation0], 0  ;;  %s5_s14 = sshll.u32 %s92_s0, 4  ;;  %s6_s14 = int_to_ptr.vmem [resolvable:$true] %s5_s14 }
   0x3   :  { %s18_s15 = scalar_lea.vmem %s6_s14, 64  ;;  %p23_p1 = scmp.lt.s32.totalorder %s6_s14, %s6_s14 }
   0x4   :  { %p19_p0 = scmp.ne.s32.totalorder %s6_s14, %s18_s15  ;;  %p24_p2 = scmp.lt.s32.totalorder %s18_s15, %s18_s15 }
   0x6   :  { %p25_p3 = por %p24_p2, %p23_p1 }
   0x8   :  { %p26_p4 = pnand %p25_p3, %p19_p0 }
   0xa   :  { %29 = shalt.err (!%p26_p4)  }
   0xb   :  { %8 = dma.vmem_to_hbm [thread:$0]  %s6_s14, 64, %s94_s2, [#allocation0] }
   0xc   :  { %61 = dma.done.wait [#allocation0], 64  }
   0xd   :  { %62 = vsyncadd [#allocation0], 4294967232 }
   0xe   :  { %10 = vsyncpa [#allocation0], 1 }
   0xf   :  { %11 = vsyncpa [#allocation1], 0  ;;  %s12_s0 = sshll.u32 %s93_s1, 4  ;;  %s13_s0 = int_to_ptr.vmem [resolvable:$true] %s12_s0 }
  0x10   :  { %s38_s20 = scalar_lea.vmem %s13_s0, 64  ;;  %p43_p6 = scmp.lt.s32.totalorder %s13_s0, %s13_s0 }
  0x11   :  { %p39_p5 = scmp.ne.s32.totalorder %s13_s0, %s38_s20  ;;  %p44_p7 = scmp.lt.s32.totalorder %s38_s20, %s38_s20 }
  0x13   :  { %p45_p8 = por %p44_p7, %p43_p6 }
  0x15   :  { %p46_p9 = pnand %p45_p8, %p39_p5 }
  0x17   :  { %49 = shalt.err (!%p46_p9)  }
  0x18   :  { %15 = dma.vmem_to_hbm [thread:$0]  %s13_s0, 64, %s3_s11, [#allocation1] }
  0x19   :  { %63 = dma.done.wait [#allocation1], 64  }
  0x1a   :  { %64 = vsyncadd [#allocation1], 4294967232 }
  0x1b   :  { %17 = vsyncpa [#allocation1], 1 }

// kernel: _log_spectrum_jit.1
= control target key start
LH: loop header
LB: loop body
LE: loop exit
PB: predicated region body
PF: predicated region fallthrough
CT: control target
= control target key end

     0   :  { %7 = vsyncpa [#allocation3], 0  ;;  %s343_s9 = smov [#allocation2]   ;;  %s382_s0 = inlined_call_operand.vmem [shape: f32[8,256], index: 0, kind: input, shape index: {}]   ;;  %s383_s1 = inlined_call_operand.hbm [shape: f32[256,512], index: 1, kind: input, shape index: {}]   ;;  %s384_s2 = inlined_call_operand.vmem [shape: f32[8,512], index: 2, kind: output, shape index: {}]  }
   0x1   :  { %s15_s10 = sshll.u32 %s343_s9, 4  ;;  %s16_s10 = int_to_ptr.vmem [resolvable:$true] %s15_s10 }
   0x2   :  { %s329_s11 = scalar_lea.vmem %s16_s10, 16384  ;;  %p334_p1 = scmp.lt.s32.totalorder %s16_s10, %s16_s10 }
   0x3   :  { %p330_p0 = scmp.ne.s32.totalorder %s16_s10, %s329_s11  ;;  %p335_p2 = scmp.lt.s32.totalorder %s329_s11, %s329_s11 }
   0x5   :  { %p336_p3 = por %p335_p2, %p334_p1 }
   0x7   :  { %p337_p4 = pnand %p336_p3, %p330_p0 }
   0x9   :  { %340 = shalt.err (!%p337_p4)
}
   0xa   :  { %s344_s12 = smov 512   ;;  %s345_s13 = smov 32  }
   0xb   :  { %21 = dma.hbm_to_vmem [thread:$0]  %s383_s1, 16384, %s16_s10, [#allocation3], %s344_s12, %s344_s12, %s345_s13  }
   0xc   :  { %341 = dma.done.wait [#allocation3], 16384  }
   0xd   :  { %342 = vsyncadd [#allocation3], 4294950912  ;;  %v88_v0 = vld [vmem:[#allocation2 + $0x1e8] sm:$0xff]  ;;  %v90_v1 = vld [vmem:[#allocation2 + $0x1f8] sm:$0xff] }
   0xe   :  { %v87_v2 = vld [vmem:[#allocation2 + $0x1e0] sm:$0xff]  ;;  %155 = vmatprep.subr.mxu0 %v88_v0  ;;  %226 = vmatprep.subr.mxu1 %v90_v1  ;;  %v89_v3 = vld [vmem:[#allocation2 + $0x1f0] sm:$0xff]  ;;  %v84_v4 = vld [vmem:[#allocation2 + $0x1c8] sm:$0xff] }
   0xf   :  { %v86_v5 = vld [vmem:[#allocation2 + $0x1d8] sm:$0xff]  ;;  %156 = vmatpush1.msra.mxu0 %v87_v2  ;;  %227 = vmatpush1.msra.mxu1 %v89_v3  ;;  %v83_v6 = vld [vmem:[#allocation2 + $0x1c0] sm:$0xff]  ;;  %v85_v7 = vld [vmem:[#allocation2 + $0x1d0] sm:$0xff] }
  0x10   :  { %v80_v8 = vld [vmem:[#allocation2 + $0x1a8] sm:$0xff]  ;;  %157 = vmatprep.subr.mxu0 %v84_v4  ;;  %228 = vmatprep.subr.mxu1 %v86_v5  ;;  %v82_v9 = vld [vmem:[#allocation2 + $0x1b8] sm:$0xff]  ;;  %v79_v10 = vld [vmem:[#allocation2 + $0x1a0] sm:$0xff] }
  0x11   :  { %v81_v11 = vld [vmem:[#allocation2 + $0x1b0] sm:$0xff]  ;;  %158 = vmatpush1.msra.mxu0 %v83_v6  ;;  %229 = vmatpush1.msra.mxu1 %v85_v7  ;;  %v76_v12 = vld [vmem:[#allocation2 + $0x188] sm:$0xff]  ;;  %v78_v13 = vld [vmem:[#allocation2 + $0x198] sm:$0xff] }
  0x12   :  { %159 = vmatprep.subr.mxu0 %v80_v8  ;;  %230 = vmatprep.subr.mxu1 %v82_v9  ;;  %v75_v14 = vld [vmem:[#allocation2 + $0x180] sm:$0xff]  ;;  %v77_v15 = vld [vmem:[#allocation2 + $0x190] sm:$0xff]  ;;  %v72_v16 = vld [vmem:[#allocation2 + $0x168] sm:$0xff] }
  0x13   :  { %160 = vmatpush1.msra.mxu0 %v79_v10  ;;  %231 = vmatpush1.msra.mxu1 %v81_v11  ;;  %v74_v17 = vld [vmem:[#allocation2 + $0x178] sm:$0xff]  ;;  %v71_v18 = vld [vmem:[#allocation2 + $0x160] sm:$0xff]  ;;  %v73_v19 = vld [vmem:[#allocation2 + $0x170] sm:$0xff] }
  0x14   :  { %161 = vmatprep.subr.mxu0 %v76_v12  ;;  %232 = vmatprep.subr.mxu1 %v78_v13  ;;  %v68_v20 = vld [vmem:[#allocation2 + $0x148] sm:$0xff]  ;;  %v70_v21 = vld [vmem:[#allocation2 + $0x158] sm:$0xff]  ;;  %v67_v22 = vld [vmem:[#allocation2 + $0x140] sm:$0xff] }
  0x15   :  { %162 = vmatpush1.msra.mxu0 %v75_v14  ;;  %233 = vmatpush1.msra.mxu1 %v77_v15  ;;  %v69_v23 = vld [vmem:[#allocation2 + $0x150] sm:$0xff]  ;;  %v64_v24 = vld [vmem:[#allocation2 + $0x128] sm:$0xff]  ;;  %v66_v25 = vld [vmem:[#allocation2 + $0x138] sm:$0xff] }
  0x16   :  { %163 = vmatprep.subr.mxu0 %v72_v16  ;;  %234 = vmatprep.subr.mxu1 %v74_v17  ;;  %v63_v26 = vld [vmem:[#allocation2 + $0x120] sm:$0xff]  ;;  %v65_v27 = vld [vmem:[#allocation2 + $0x130] sm:$0xff]  ;;  %v60_v28 = vld [vmem:[#allocation2 + $0x108] sm:$0xff] }
  0x17   :  { %164 = vmatpush1.msra.mxu0 %v71_v18  ;;  %235 = vmatpush1.msra.mxu1 %v73_v19  ;;  %v62_v29 = vld [vmem:[#allocation2 + $0x118] sm:$0xff]  ;;  %v59_v30 = vld [vmem:[#allocation2 + $0x100] sm:$0xff]  ;;  %v61_v31 = vld [vmem:[#allocation2 + $0x110] sm:$0xff] }
  0x18   :  { %165 = vmatprep.subr.mxu0 %v68_v20  ;;  %236 = vmatprep.subr.mxu1 %v70_v21  ;;  %v56_v32 = vld [vmem:[#allocation2 + $0xe8] sm:$0xff]  ;;  %v58_v33 = vld [vmem:[#allocation2 + $0xf8] sm:$0xff]  ;;  %v55_v34 = vld [vmem:[#allocation2 + $0xe0] sm:$0xff] }
  0x19   :  { %166 = vmatpush1.msra.mxu0 %v67_v22  ;;  %237 = vmatpush1.msra.mxu1 %v69_v23  ;;  %v57_v35 = vld [vmem:[#allocation2 + $0xf0] sm:$0xff]  ;;  %v52_v36 = vld [vmem:[#allocation2 + $0xc8] sm:$0xff]  ;;  %v54_v37 = vld [vmem:[#allocation2 + $0xd8] sm:$0xff] }
  0x1a   :  { %167 = vmatprep.subr.mxu0 %v64_v24  ;;  %238 = vmatprep.subr.mxu1 %v66_v25  ;;  %v51_v38 = vld [vmem:[#allocation2 + $0xc0] sm:$0xff]  ;;  %v53_v39 = vld [vmem:[#allocation2 + $0xd0] sm:$0xff]  ;;  %v48_v40 = vld [vmem:[#allocation2 + $0xa8] sm:$0xff] }
  0x1b   :  { %168 = vmatpush1.msra.mxu0 %v63_v26  ;;  %239 = vmatpush1.msra.mxu1 %v65_v27  ;;  %v50_v41 = vld [vmem:[#allocation2 + $0xb8] sm:$0xff]  ;;  %v47_v42 = vld [vmem:[#allocation2 + $0xa0] sm:$0xff]  ;;  %v49_v43 = vld [vmem:[#allocation2 + $0xb0] sm:$0xff] }
  0x1c   :  { %169 = vmatprep.subr.mxu0 %v60_v28  ;;  %240 = vmatprep.subr.mxu1 %v62_v29  ;;  %v44_v44 = vld [vmem:[#allocation2 + $0x88] sm:$0xff]  ;;  %v46_v45 = vld [vmem:[#allocation2 + $0x98] sm:$0xff]  ;;  %v43_v46 = vld [vmem:[#allocation2 + $0x80] sm:$0xff] }
  0x1d   :  { %170 = vmatpush1.msra.mxu0 %v59_v30  ;;  %241 = vmatpush1.msra.mxu1 %v61_v31  ;;  %v45_v47 = vld [vmem:[#allocation2 + $0x90] sm:$0xff]  ;;  %v40_v48 = vld [vmem:[#allocation2 + $0x68] sm:$0xff]  ;;  %v42_v49 = vld [vmem:[#allocation2 + $0x78] sm:$0xff] }
  0x1e   :  { %171 = vmatprep.subr.mxu0 %v56_v32  ;;  %242 = vmatprep.subr.mxu1 %v58_v33  ;;  %v39_v50 = vld [vmem:[#allocation2 + $0x60] sm:$0xff]  ;;  %v41_v51 = vld [vmem:[#allocation2 + $0x70] sm:$0xff]  ;;  %v36_v52 = vld [vmem:[#allocation2 + $0x48] sm:$0xff] }
  0x1f   :  { %172 = vmatpush1.msra.mxu0 %v55_v34  ;;  %243 = vmatpush1.msra.mxu1 %v57_v35  ;;  %v38_v53 = vld [vmem:[#allocation2 + $0x58] sm:$0xff]  ;;  %v35_v54 = vld [vmem:[#allocation2 + $0x40] sm:$0xff]  ;;  %v37_v55 = vld [vmem:[#allocation2 + $0x50] sm:$0xff] }
  0x20   :  { %173 = vmatprep.subr.mxu0 %v52_v36  ;;  %244 = vmatprep.subr.mxu1 %v54_v37  ;;  %v32_v56 = vld [vmem:[#allocation2 + $0x28] sm:$0xff]  ;;  %v34_v57 = vld [vmem:[#allocation2 + $0x38] sm:$0xff]  ;;  %v31_v58 = vld [vmem:[#allocation2 + $0x20] sm:$0xff] }
  0x21   :  { %174 = vmatpush1.msra.mxu0 %v51_v38  ;;  %245 = vmatpush1.msra.mxu1 %v53_v39  ;;  %v33_v59 = vld [vmem:[#allocation2 + $0x30] sm:$0xff]  ;;  %v28_v60 = vld [vmem:[#allocation2 + $0x8] sm:$0xff]  ;;  %v30_v61 = vld [vmem:[#allocation2 + $0x18] sm:$0xff] }
  0x22   :  { %175 = vmatprep.subr.mxu0 %v48_v40  ;;  %246 = vmatprep.subr.mxu1 %v50_v41  ;;  %v27_v62 = vld [vmem:[#allocation2] sm:$0xff]  ;;  %v29_v63 = vld [vmem:[#allocation2 + $0x10] sm:$0xff]  ;;  %v152_v0 = vld [vmem:[#allocation2 + $0x3e8] sm:$0xff] }
  0x23   :  { %176 = vmatpush1.msra.mxu0 %v47_v42  ;;  %247 = vmatpush1.msra.mxu1 %v49_v43  ;;  %v154_v1 = vld [vmem:[#allocation2 + $0x3f8] sm:$0xff]  ;;  %v151_v2 = vld [vmem:[#allocation2 + $0x3e0] sm:$0xff]  ;;  %v153_v3 = vld [vmem:[#allocation2 + $0x3f0] sm:$0xff] }
  0x24   :  { %177 = vmatprep.subr.mxu0 %v44_v44  ;;  %248 = vmatprep.subr.mxu1 %v46_v45  ;;  %v148_v4 = vld [vmem:[#allocation2 + $0x3c8] sm:$0xff]  ;;  %v150_v5 = vld [vmem:[#allocation2 + $0x3d8] sm:$0xff]  ;;  %v147_v6 = vld [vmem:[#allocation2 + $0x3c0] sm:$0xff] }
  0x25   :  { %178 = vmatpush1.msra.mxu0 %v43_v46  ;;  %249 = vmatpush1.msra.mxu1 %v45_v47  ;;  %v149_v7 = vld [vmem:[#allocation2 + $0x3d0] sm:$0xff]  ;;  %v144_v8 = vld [vmem:[#allocation2 + $0x3a8] sm:$0xff]  ;;  %v146_v9 = vld [vmem:[#allocation2 + $0x3b8] sm:$0xff] }
  0x26   :  { %179 = vmatprep.subr.mxu0 %v40_v48  ;;  %250 = vmatprep.subr.mxu1 %v42_v49  ;;  %v143_v10 = vld [vmem:[#allocation2 + $0x3a0] sm:$0xff]  ;;  %v145_v11 = vld [vmem:[#allocation2 + $0x3b0] sm:$0xff]  ;;  %v140_v12 = vld [vmem:[#allocation2 + $0x388] sm:$0xff] }
  0x27   :  { %180 = vmatpush1.msra.mxu0 %v39_v50  ;;  %251 = vmatpush1.msra.mxu1 %v41_v51  ;;  %v142_v13 = vld [vmem:[#allocation2 + $0x398] sm:$0xff]  ;;  %v139_v14 = vld [vmem:[#allocation2 + $0x380] sm:$0xff]  ;;  %v141_v15 = vld [vmem:[#allocation2 + $0x390] sm:$0xff] }
  0x28   :  { %181 = vmatprep.subr.mxu0 %v36_v52  ;;  %252 = vmatprep.subr.mxu1 %v38_v53  ;;  %v136_v16 = vld [vmem:[#allocation2 + $0x368] sm:$0xff]  ;;  %v138_v17 = vld [vmem:[#allocation2 + $0x378] sm:$0xff]  ;;  %v135_v18 = vld [vmem:[#allocation2 + $0x360] sm:$0xff] }
  0x29   :  { %182 = vmatpush1.msra.mxu0 %v35_v54  ;;  %253 = vmatpush1.msra.mxu1 %v37_v55  ;;  %v137_v19 = vld [vmem:[#allocation2 + $0x370] sm:$0xff]  ;;  %v132_v20 = vld [vmem:[#allocation2 + $0x348] sm:$0xff]  ;;  %v134_v21 = vld [vmem:[#allocation2 + $0x358] sm:$0xff] }
  0x2a   :  { %183 = vmatprep.subr.mxu0 %v32_v56  ;;  %254 = vmatprep.subr.mxu1 %v34_v57  ;;  %v131_v22 = vld [vmem:[#allocation2 + $0x340] sm:$0xff]  ;;  %v133_v23 = vld [vmem:[#allocation2 + $0x350] sm:$0xff]  ;;  %v128_v24 = vld [vmem:[#allocation2 + $0x328] sm:$0xff] }
  0x2b   :  { %184 = vmatpush1.msra.mxu0 %v31_v58  ;;  %255 = vmatpush1.msra.mxu1 %v33_v59  ;;  %v130_v25 = vld [vmem:[#allocation2 + $0x338] sm:$0xff]  ;;  %v127_v26 = vld [vmem:[#allocation2 + $0x320] sm:$0xff]  ;;  %v129_v27 = vld [vmem:[#allocation2 + $0x330] sm:$0xff] }
  0x2c   :  { %185 = vmatprep.subr.mxu0 %v28_v60  ;;  %256 = vmatprep.subr.mxu1 %v30_v61  ;;  %v124_v28 = vld [vmem:[#allocation2 + $0x308] sm:$0xff]  ;;  %v126_v29 = vld [vmem:[#allocation2 + $0x318] sm:$0xff]  ;;  %v123_v30 = vld [vmem:[#allocation2 + $0x300] sm:$0xff] }
  0x2d   :  { %186 = vmatpush1.msra.mxu0 %v27_v62  ;;  %257 = vmatpush1.msra.mxu1 %v29_v63  ;;  %v125_v31 = vld [vmem:[#allocation2 + $0x310] sm:$0xff]  ;;  %v120_v32 = vld [vmem:[#allocation2 + $0x2e8] sm:$0xff]  ;;  %v122_v33 = vld [vmem:[#allocation2 + $0x2f8] sm:$0xff] }
  0x2e   :  { %187 = vmatprep.subr.mxu0 %v152_v0  ;;  %258 = vmatprep.subr.mxu1 %v154_v1  ;;  %v119_v34 = vld [vmem:[#allocation2 + $0x2e0] sm:$0xff]  ;;  %v121_v35 = vld [vmem:[#allocation2 + $0x2f0] sm:$0xff]  ;;  %v116_v36 = vld [vmem:[#allocation2 + $0x2c8] sm:$0xff] }
  0x2f   :  { %188 = vmatpush2.msra.mxu0 %v151_v2  ;;  %259 = vmatpush2.msra.mxu1 %v153_v3  ;;  %v118_v37 = vld [vmem:[#allocation2 + $0x2d8] sm:$0xff]  ;;  %v115_v38 = vld [vmem:[#allocation2 + $0x2c0] sm:$0xff]  ;;  %v117_v39 = vld [vmem:[#allocation2 + $0x2d0] sm:$0xff] }
  0x30   :  { %189 = vmatprep.subr.mxu0 %v148_v4  ;;  %260 = vmatprep.subr.mxu1 %v150_v5  ;;  %v112_v40 = vld [vmem:[#allocation2 + $0x2a8] sm:$0xff]  ;;  %v114_v41 = vld [vmem:[#allocation2 + $0x2b8] sm:$0xff]  ;;  %v111_v42 = vld [vmem:[#allocation2 + $0x2a0] sm:$0xff] }
  0x31   :  { %190 = vmatpush2.msra.mxu0 %v147_v6  ;;  %261 = vmatpush2.msra.mxu1 %v149_v7  ;;  %v113_v43 = vld [vmem:[#allocation2 + $0x2b0] sm:$0xff]  ;;  %v108_v44 = vld [vmem:[#allocation2 + $0x288] sm:$0xff]  ;;  %v110_v45 = vld [vmem:[#allocation2 + $0x298] sm:$0xff] }
  0x32   :  { %191 = vmatprep.subr.mxu0 %v144_v8  ;;  %262 = vmatprep.subr.mxu1 %v146_v9  ;;  %v107_v46 = vld [vmem:[#allocation2 + $0x280] sm:$0xff]  ;;  %v109_v47 = vld [vmem:[#allocation2 + $0x290] sm:$0xff]  ;;  %v104_v48 = vld [vmem:[#allocation2 + $0x268] sm:$0xff] }
  0x33   :  { %192 = vmatpush2.msra.mxu0 %v143_v10  ;;  %263 = vmatpush2.msra.mxu1 %v145_v11  ;;  %v106_v49 = vld [vmem:[#allocation2 + $0x278] sm:$0xff]  ;;  %v103_v50 = vld [vmem:[#allocation2 + $0x260] sm:$0xff]  ;;  %v105_v51 = vld [vmem:[#allocation2 + $0x270] sm:$0xff] }
  0x34   :  { %193 = vmatprep.subr.mxu0 %v140_v12  ;;  %264 = vmatprep.subr.mxu1 %v142_v13  ;;  %v100_v52 = vld [vmem:[#allocation2 + $0x248] sm:$0xff]  ;;  %v102_v53 = vld [vmem:[#allocation2 + $0x258] sm:$0xff]  ;;  %v99_v54 = vld [vmem:[#allocation2 + $0x240] sm:$0xff] }
  0x35   :  { %194 = vmatpush2.msra.mxu0 %v139_v14  ;;  %265 = vmatpush2.msra.mxu1 %v141_v15  ;;  %v101_v55 = vld [vmem:[#allocation2 + $0x250] sm:$0xff]  ;;  %v96_v56 = vld [vmem:[#allocation2 + $0x228] sm:$0xff]  ;;  %v98_v57 = vld [vmem:[#allocation2 + $0x238] sm:$0xff] }
  0x36   :  { %195 = vmatprep.subr.mxu0 %v136_v16  ;;  %266 = vmatprep.subr.mxu1 %v138_v17  ;;  %v95_v58 = vld [vmem:[#allocation2 + $0x220] sm:$0xff]  ;;  %v97_v59 = vld [vmem:[#allocation2 + $0x230] sm:$0xff]  ;;  %v92_v60 = vld [vmem:[#allocation2 + $0x208] sm:$0xff] }
  0x37   :  { %196 = vmatpush2.msra.mxu0 %v135_v18  ;;  %267 = vmatpush2.msra.mxu1 %v137_v19  ;;  %v94_v61 = vld [vmem:[#allocation2 + $0x218] sm:$0xff]  ;;  %v91_v62 = vld [vmem:[#allocation2 + $0x200] sm:$0xff]  ;;  %v26_v63 = vld [vmem:[%s382_s0 + $0x8] sm:$0xff] }
  0x38   :  { %197 = vmatprep.subr.mxu0 %v132_v20  ;;  %268 = vmatprep.subr.mxu1 %v134_v21  ;;  %v93_v0 = vld [vmem:[#allocation2 + $0x210] sm:$0xff]  ;;  %v25_v1 = vld [vmem:[%s382_s0] sm:$0xff] }
  0x39   :  { %198 = vmatpush2.msra.mxu0 %v131_v22  ;;  %269 = vmatpush2.msra.mxu1 %v133_v23 }
  0x3a   :  { %199 = vmatprep.subr.mxu0 %v128_v24  ;;  %270 = vmatprep.subr.mxu1 %v130_v25 }
  0x3b   :  { %200 = vmatpush2.msra.mxu0 %v127_v26  ;;  %271 = vmatpush2.msra.mxu1 %v129_v27 }
  0x3c   :  { %201 = vmatprep.subr.mxu0 %v124_v28  ;;  %272 = vmatprep.subr.mxu1 %v126_v29 }
  0x3d   :  { %202 = vmatpush2.msra.mxu0 %v123_v30  ;;  %273 = vmatpush2.msra.mxu1 %v125_v31 }
  0x3e   :  { %203 = vmatprep.subr.mxu0 %v120_v32  ;;  %274 = vmatprep.subr.mxu1 %v122_v33 }
  0x3f   :  { %204 = vmatpush2.msra.mxu0 %v119_v34  ;;  %275 = vmatpush2.msra.mxu1 %v121_v35 }
  0x40   :  { %205 = vmatprep.subr.mxu0 %v116_v36  ;;  %276 = vmatprep.subr.mxu1 %v118_v37 }
  0x41   :  { %206 = vmatpush2.msra.mxu0 %v115_v38  ;;  %277 = vmatpush2.msra.mxu1 %v117_v39 }
  0x42   :  { %207 = vmatprep.subr.mxu0 %v112_v40  ;;  %278 = vmatprep.subr.mxu1 %v114_v41 }
  0x43   :  { %208 = vmatpush2.msra.mxu0 %v111_v42  ;;  %279 = vmatpush2.msra.mxu1 %v113_v43 }
  0x44   :  { %209 = vmatprep.subr.mxu0 %v108_v44  ;;  %280 = vmatprep.subr.mxu1 %v110_v45 }
  0x45   :  { %210 = vmatpush2.msra.mxu0 %v107_v46  ;;  %281 = vmatpush2.msra.mxu1 %v109_v47 }
  0x46   :  { %211 = vmatprep.subr.mxu0 %v104_v48  ;;  %282 = vmatprep.subr.mxu1 %v106_v49 }
  0x47   :  { %212 = vmatpush2.msra.mxu0 %v103_v50  ;;  %283 = vmatpush2.msra.mxu1 %v105_v51 }
  0x48   :  { %213 = vmatprep.subr.mxu0 %v100_v52  ;;  %284 = vmatprep.subr.mxu1 %v102_v53 }
  0x49   :  { %214 = vmatpush2.msra.mxu0 %v99_v54  ;;  %285 = vmatpush2.msra.mxu1 %v101_v55 }
  0x4a   :  { %215 = vmatprep.subr.mxu0 %v96_v56  ;;  %286 = vmatprep.subr.mxu1 %v98_v57 }
  0x4b   :  { %216 = vmatpush2.msra.mxu0 %v95_v58  ;;  %287 = vmatpush2.msra.mxu1 %v97_v59 }
  0x4c   :  { %217 = vmatprep.subr.mxu0 %v92_v60  ;;  %288 = vmatprep.subr.mxu1 %v94_v61 }
  0x4d   :  { %218 = vmatpush2.msra.mxu0 %v91_v62  ;;  %219 = vmatprep.mubr.f32.mxu0 %v26_v63 }
  0x4e   :  { %289 = vmatpush2.msra.mxu1 %v93_v0  ;;  %290 = vmatprep.mubr.f32.mxu1 %v26_v63 }
  0x4f   :  { %220 = vmatmul.mubr.f32.vlgmr.msra.gmra.mxu0 %v25_v1  ;;  %291 = vmatmul.mubr.f32.vlgmr.msra.gmra.mxu1 %v25_v1 }
 0x10f   :  { %v221_v2 = vpop.f32.mrf.mxu0  ;;  %v292_v3 = vpop.f32.mrf.mxu1 }
 0x110   :  { %v297_v4 = vmul.f32 %v221_v2, %v221_v2  ;;  %v307_v5 = vmul.f32 2.0, %v221_v2  ;;  %v299_v6 = vmul.f32 %v292_v3, %v292_v3 }
 0x111   :  { %v223_v7 = vpop.f32.mrf.mxu0  ;;  %v294_v8 = vpop.f32.mrf.mxu1 }
 0x112   :  { %v301_v9 = vsub.f32 %v297_v4, %v299_v6  ;;  %v309_v10 = vmul.f32 %v307_v5, %v292_v3  ;;  %v298_v11 = vmul.f32 %v223_v7, %v223_v7  ;;  %v308_v12 = vmul.f32 2.0, %v223_v7 }
 0x113   :  { %v300_v13 = vmul.f32 %v294_v8, %v294_v8 }
 0x114   :  { %v303_v14 = vadd.f32 1e-07, %v301_v9  ;;  %311 = vst [vmem:[%s384_s2 + $0x10] sm:$0xff] %v309_v10  ;;  %v310_v15 = vmul.f32 %v308_v12, %v294_v8 }
 0x115   :  { %v302_v16 = vsub.f32 %v298_v11, %v300_v13 }
 0x116   :  { %305 = vst [vmem:[%s384_s2] sm:$0xff] %v303_v14  ;;  %312 = vst [vmem:[%s384_s2 + $0x18] sm:$0xff] %v310_v15 }
 0x117   :  { %v304_v17 = vadd.f32 1e-07, %v302_v16 }
 0x119   :  { %306 = vst [vmem:[%s384_s2 + $0x8] sm:$0xff] %v304_v17 }
 0x11a   :  { %317 = vsyncpa [#allocation3], 1 }

</bundles_post_ra>
